<compile_context>
chip_gen: v7x
topology: tpu7x:2x2x1
jax: 0.10.0
libtpu: 0.0.40
codegen_flags: <defaults>
</compile_context>

<pallas_src>
import functools

import jax
import jax.numpy as jnp
from jax.experimental import pallas as pl
from jax.experimental.pallas import tpu as pltpu


def _round_up(x, m):
    return (x + m - 1) // m * m


def _swish_layer(h, w_bf16, b_f32):
    """One Linear -> Swish layer: bf16 MXU matmul with f32 accumulation,
    bias add + Swish in f32 (VPU + EUP)."""
    y = jnp.dot(h.astype(jnp.bfloat16), w_bf16,
                preferred_element_type=jnp.float32)
    y = y + b_f32
    return y * jax.nn.sigmoid(y)


def _make_encoder_kernel(num_rest):
    """Fused kernel: (Linear -> Swish) x (1 + num_rest) on one batch tile.

    x_ref : [tm, Kin_pad]                 f32 padded input tile
    w0_ref: [Kin_pad, Dh_pad]             bf16 layer-0 weight (resident)
    b0_ref: [1, Dh_pad]                   f32 layer-0 bias   (resident)
    wr_ref: [num_rest, Dh_pad, Dh_pad]    bf16 hidden weights (resident)
    br_ref: [num_rest, 1, Dh_pad]         f32 hidden biases   (resident)
    o_ref : [tm, Dh_pad]                  f32 output tile
    """
    if num_rest:
        def kernel(x_ref, w0_ref, b0_ref, wr_ref, br_ref, o_ref):
            h = _swish_layer(x_ref[...], w0_ref[...], b0_ref[...])
            for l in range(num_rest):          # static unroll, resident weights
                h = _swish_layer(h, wr_ref[l], br_ref[l])
            o_ref[...] = h.astype(o_ref.dtype)
    else:
        def kernel(x_ref, w0_ref, b0_ref, o_ref):
            o_ref[...] = _swish_layer(
                x_ref[...], w0_ref[...], b0_ref[...]).astype(o_ref.dtype)
    return kernel


def _fused_encoder(xp, w0, b0, wr, br, *, tm):
    """xp: [Bp, Kin_pad] f32; w0: [Kin_pad, Dh_pad] bf16; b0: [1, Dh_pad] f32;
    wr: [L-1, Dh_pad, Dh_pad] bf16 or None; br: [L-1, 1, Dh_pad] f32 or None."""
    Bp, Kin_pad = xp.shape
    Dh_pad = w0.shape[1]
    num_rest = 0 if wr is None else wr.shape[0]
    L = num_rest + 1

    in_specs = [
        # Per-tile input; index over the batch-tile grid axis.
        pl.BlockSpec((tm, Kin_pad), lambda i: (i, 0)),
        # Resident weights / biases: constant block index -> DMA'd once.
        pl.BlockSpec((Kin_pad, Dh_pad), lambda i: (0, 0)),
        pl.BlockSpec((1, Dh_pad), lambda i: (0, 0)),
    ]
    args = [xp, w0, b0]
    if num_rest:
        in_specs += [
            pl.BlockSpec((num_rest, Dh_pad, Dh_pad), lambda i: (0, 0, 0)),
            pl.BlockSpec((num_rest, 1, Dh_pad), lambda i: (0, 0, 0)),
        ]
        args += [wr, br]

    # VMEM budget: resident weights (counted 2x for safety) + double-buffered
    # x/out tiles + margin. Clamped so it stays within every chip's physical
    # VMEM (v7x has 64 MiB/TC).
    weight_bytes = (w0.size * 2 + b0.size * 4
                    + (wr.size * 2 + br.size * 4 if num_rest else 0))
    tile_bytes = 2 * tm * Kin_pad * 4 + 2 * tm * Dh_pad * 4
    vmem_limit = int(min(max(2 * weight_bytes + tile_bytes + (4 << 20),
                             16 << 20), 48 << 20))
    # TODO(synk): if the resident bf16 weight stack itself approaches ~40 MiB
    # (very large hidden sizes), fall back to a (batch, layer) grid with
    # per-layer weight streaming and K/N tiling instead of a resident stack.

    flops = 2 * Bp * (Kin_pad * Dh_pad + num_rest * Dh_pad * Dh_pad)
    transcendentals = Bp * Dh_pad * L            # one sigmoid per output elem
    bytes_accessed = (xp.size * 4 + weight_bytes + Bp * Dh_pad * 4)

    return pl.pallas_call(
        _make_encoder_kernel(num_rest),
        out_shape=jax.ShapeDtypeStruct((Bp, Dh_pad), jnp.float32),
        grid_spec=pltpu.PrefetchScalarGridSpec(
            num_scalar_prefetch=0,
            grid=(Bp // tm,),
            in_specs=in_specs,
            out_specs=pl.BlockSpec((tm, Dh_pad), lambda i: (i, 0)),
        ),
        compiler_params=pltpu.CompilerParams(
            dimension_semantics=("parallel",),
            vmem_limit_bytes=vmem_limit),
        cost_estimate=pl.CostEstimate(
            flops=flops, transcendentals=transcendentals,
            bytes_accessed=bytes_accessed),
    )(*args)


def init_linear_encoder_params(key, input_size, num_layers, hidden_size,
                               kernel_gain=1.0):
    """Params mirroring linear_layer(KaimingHeNormal, gain=1.0).

    torch.nn.init.kaiming_normal_(w, nonlinearity='linear') draws
    N(0, std^2) with std = 1/sqrt(fan_in); bias is zero-initialized.
    Weights are stored as [in, out] (transposed vs. torch's [out, in]) so
    the in-kernel matmul is x @ W.
    """
    params = []
    sizes = [input_size] + [hidden_size] * num_layers
    for i in range(num_layers):
        fan_in, fan_out = sizes[i], sizes[i + 1]
        key, sub = jax.random.split(key)
        std = 1.0 / jnp.sqrt(jnp.float32(fan_in))
        w = (jax.random.normal(sub, (fan_in, fan_out), dtype=jnp.float32)
             * std * kernel_gain)
        b = jnp.zeros((1, fan_out), dtype=jnp.float32)
        params.append((w, b))
    return params


def prepare_linear_encoder_params(params):
    """One-time packing of the f32 [in,out] params for the fused kernel:
    lane-dense zero padding, bf16 weights, stacked hidden layers.
    Call once and reuse the result for every forward."""
    L = len(params)
    input_size, hidden_size = params[0][0].shape
    Kin_pad = _round_up(input_size, 128)
    Dh_pad = _round_up(hidden_size, 128)

    w0, b0 = params[0]
    w0_p = jnp.zeros((Kin_pad, Dh_pad), jnp.bfloat16).at[
        :input_size, :hidden_size].set(w0.astype(jnp.bfloat16))
    b0_p = jnp.zeros((1, Dh_pad), jnp.float32).at[:, :hidden_size].set(
        b0.reshape(1, -1).astype(jnp.float32))

    if L > 1:
        wr = jnp.stack([
            jnp.zeros((Dh_pad, Dh_pad), jnp.bfloat16).at[
                :hidden_size, :hidden_size].set(w.astype(jnp.bfloat16))
            for w, _ in params[1:]])
        br = jnp.stack([
            jnp.zeros((1, Dh_pad), jnp.float32).at[:, :hidden_size].set(
                b.reshape(1, -1).astype(jnp.float32))
            for _, b in params[1:]])
    else:
        wr, br = None, None
    return {"w0": w0_p, "b0": b0_p, "wr": wr, "br": br}


@functools.partial(jax.jit, static_argnames=("input_size", "hidden_size"))
def linear_encoder_forward(x, packed, *, input_size, hidden_size):
    """Forward pass of LinearEncoder: (Linear -> Swish) x num_layers,
    executed as one fused, tiled Pallas kernel on pre-packed params."""
    B = x.shape[0]
    Kin_pad = packed["w0"].shape[0]

    # >= 2 batch tiles when B allows (v7x has 2 TensorCores sharing a chip);
    # cap at 512 rows for weight reuse without blowing VMEM.
    tm = max(8, min(512, _round_up(-(-B // 2), 8)))
    Bp = _round_up(B, tm)

    xp = jnp.zeros((Bp, Kin_pad), jnp.float32).at[:B, :input_size].set(
        x.astype(jnp.float32))
    out = _fused_encoder(xp, packed["w0"], packed["b0"],
                         packed["wr"], packed["br"], tm=tm)
    return out[:B, :hidden_size]


def _reference_forward(x, params):
    h = x
    for w, b in params:
        y = h @ w + b
        h = y * jax.nn.sigmoid(y)
    return h


if __name__ == "__main__":
    key = jax.random.PRNGKey(0)
    batch = 8
    input_size = 32
    num_layers = 2
    hidden_size = 32

    kx, kp = jax.random.split(key)
    x = jax.random.normal(kx, (batch, input_size), dtype=jnp.float32)
    params = init_linear_encoder_params(kp, input_size, num_layers, hidden_size)
    packed = prepare_linear_encoder_params(params)   # one-time packing

    out = linear_encoder_forward(x, packed, input_size=input_size,
                                 hidden_size=hidden_size)
    out = jax.block_until_ready(out)

    ref = _reference_forward(x, params)
    assert out.shape == (batch, hidden_size)
    # bf16 MXU operands -> loosened tolerance vs. the pure-f32 reference.
    assert jnp.allclose(out, ref, atol=3e-2, rtol=3e-2), float(
        jnp.max(jnp.abs(out - ref)))

    print("KERNEL_OK")
</pallas_src>

<mosaic_0001>
module attributes {stable_mosaic.version = 11 : i64} {
  func.func @kernel(%arg0: i32, %arg1: memref<8x128xf32, #tpu.memory_space<vmem>>, %arg2: memref<128x128xbf16, #tpu.memory_space<vmem>>, %arg3: memref<1x128xf32, #tpu.memory_space<vmem>>, %arg4: memref<1x128x128xbf16, #tpu.memory_space<vmem>>, %arg5: memref<1x1x128xf32, #tpu.memory_space<vmem>>, %arg6: memref<8x128xf32, #tpu.memory_space<vmem>>) attributes {dimension_semantics = [#tpu.dimension_semantics<parallel>], iteration_bounds = array<i64: 1>, scalar_prefetch = 0 : i64, scratch_operands = 0 : i64, tpu.core_type = #tpu.core_type<tc>, window_params = [{transform_indices = @transform_0, window_bounds = array<i64: 8, 128>}, {pipeline_mode = #tpu.pipeline_mode<synchronous>, transform_indices = @transform_1, window_bounds = array<i64: 128, 128>}, {pipeline_mode = #tpu.pipeline_mode<synchronous>, transform_indices = @transform_2, window_bounds = array<i64: 1, 128>}, {pipeline_mode = #tpu.pipeline_mode<synchronous>, transform_indices = @transform_3, window_bounds = array<i64: 1, 128, 128>}, {pipeline_mode = #tpu.pipeline_mode<synchronous>, transform_indices = @transform_4, window_bounds = array<i64: 1, 1, 128>}, {transform_indices = @transform_5, window_bounds = array<i64: 8, 128>}]} {
    %c0 = arith.constant 0 : index
    %c0_0 = arith.constant 0 : index
    %0 = vector.load %arg1[%c0, %c0_0] : memref<8x128xf32, #tpu.memory_space<vmem>>, vector<8x128xf32>
    %c0_1 = arith.constant 0 : index
    %c0_2 = arith.constant 0 : index
    %1 = vector.load %arg2[%c0_1, %c0_2] : memref<128x128xbf16, #tpu.memory_space<vmem>>, vector<128x128xbf16>
    %c0_3 = arith.constant 0 : index
    %c0_4 = arith.constant 0 : index
    %2 = vector.load %arg3[%c0_3, %c0_4] : memref<1x128xf32, #tpu.memory_space<vmem>>, vector<1x128xf32>
    %3 = arith.truncf %0 : vector<8x128xf32> to vector<8x128xbf16>
    %cst = arith.constant dense<0.000000e+00> : vector<8x128xf32>
    %4 = tpu.matmul %3, %1, %cst {dimension_numbers = #tpu.dot_dimension_numbers<[1], [0], [0], [1], [0, 0, 1, 1], [], []>} : vector<8x128xbf16>, vector<128x128xbf16>, vector<8x128xf32> -> vector<8x128xf32>
    %5 = vector.broadcast %2 : vector<1x128xf32> to vector<8x128xf32>
    %6 = arith.addf %4, %5 : vector<8x128xf32>
    %7 = arith.negf %6 : vector<8x128xf32>
    %8 = math.exp %7 : vector<8x128xf32>
    %cst_5 = arith.constant 1.000000e+00 : f32
    %9 = vector.broadcast %cst_5 : f32 to vector<8x128xf32>
    %10 = arith.addf %9, %8 : vector<8x128xf32>
    %11 = arith.divf %9, %10 : vector<8x128xf32>
    %12 = arith.mulf %6, %11 : vector<8x128xf32>
    %c0_6 = arith.constant 0 : index
    %c0_7 = arith.constant 0 : index
    %c0_8 = arith.constant 0 : index
    %13 = vector.load %arg4[%c0_6, %c0_7, %c0_8] : memref<1x128x128xbf16, #tpu.memory_space<vmem>>, vector<1x128x128xbf16>
    %14 = vector.shape_cast %13 : vector<1x128x128xbf16> to vector<128x128xbf16>
    %c0_9 = arith.constant 0 : index
    %c0_10 = arith.constant 0 : index
    %c0_11 = arith.constant 0 : index
    %15 = vector.load %arg5[%c0_9, %c0_10, %c0_11] : memref<1x1x128xf32, #tpu.memory_space<vmem>>, vector<1x1x128xf32>
    %16 = vector.shape_cast %15 : vector<1x1x128xf32> to vector<1x128xf32>
    %17 = arith.truncf %12 : vector<8x128xf32> to vector<8x128xbf16>
    %cst_12 = arith.constant dense<0.000000e+00> : vector<8x128xf32>
    %18 = tpu.matmul %17, %14, %cst_12 {dimension_numbers = #tpu.dot_dimension_numbers<[1], [0], [0], [1], [0, 0, 1, 1], [], []>} : vector<8x128xbf16>, vector<128x128xbf16>, vector<8x128xf32> -> vector<8x128xf32>
    %19 = vector.broadcast %16 : vector<1x128xf32> to vector<8x128xf32>
    %20 = arith.addf %18, %19 : vector<8x128xf32>
    %21 = arith.negf %20 : vector<8x128xf32>
    %22 = math.exp %21 : vector<8x128xf32>
    %cst_13 = arith.constant 1.000000e+00 : f32
    %23 = vector.broadcast %cst_13 : f32 to vector<8x128xf32>
    %24 = arith.addf %23, %22 : vector<8x128xf32>
    %25 = arith.divf %23, %24 : vector<8x128xf32>
    %26 = arith.mulf %20, %25 : vector<8x128xf32>
    %c0_14 = arith.constant 0 : index
    %c0_15 = arith.constant 0 : index
    %27 = vector.load %arg6[%c0_14, %c0_15] : memref<8x128xf32, #tpu.memory_space<vmem>>, vector<8x128xf32>
    tpu.vector_store %arg6[%c0_14, %c0_15], %26 {strides = array<i32>} : memref<8x128xf32, #tpu.memory_space<vmem>>, vector<8x128xf32>,
    return
  }
  func.func @transform_0(%arg0: i32) -> (i32, i32) {
    %c0_i32 = arith.constant 0 : i32
    %c0_i32_0 = arith.constant 0 : i32
    return %arg0, %c0_i32 : i32, i32
  }
  func.func @transform_1(%arg0: i32) -> (i32, i32) {
    %c0_i32 = arith.constant 0 : i32
    %c0_i32_0 = arith.constant 0 : i32
    %c0_i32_1 = arith.constant 0 : i32
    return %c0_i32, %c0_i32_0 : i32, i32
  }
  func.func @transform_2(%arg0: i32) -> (i32, i32) {
    %c0_i32 = arith.constant 0 : i32
    %c0_i32_0 = arith.constant 0 : i32
    %c0_i32_1 = arith.constant 0 : i32
    return %c0_i32, %c0_i32_0 : i32, i32
  }
  func.func @transform_3(%arg0: i32) -> (i32, i32, i32) {
    %c0_i32 = arith.constant 0 : i32
    %c0_i32_0 = arith.constant 0 : i32
    %c0_i32_1 = arith.constant 0 : i32
    %c0_i32_2 = arith.constant 0 : i32
    return %c0_i32, %c0_i32_0, %c0_i32_1 : i32, i32, i32
  }
  func.func @transform_4(%arg0: i32) -> (i32, i32, i32) {
    %c0_i32 = arith.constant 0 : i32
    %c0_i32_0 = arith.constant 0 : i32
    %c0_i32_1 = arith.constant 0 : i32
    %c0_i32_2 = arith.constant 0 : i32
    return %c0_i32, %c0_i32_0, %c0_i32_1 : i32, i32, i32
  }
  func.func @transform_5(%arg0: i32) -> (i32, i32) {
    %c0_i32 = arith.constant 0 : i32
    %c0_i32_0 = arith.constant 0 : i32
    return %arg0, %c0_i32 : i32, i32
  }
}

</mosaic_0001>

<bundles_post_ra>
// kernel: linear_encoder_forward.1
= control target key start
LH: loop header
LB: loop body
LE: loop exit
PB: predicated region body
PF: predicated region fallthrough
CT: control target
= control target key end

     0   :  { %10 = vsyncpa [#allocation3], 0  ;;  %s569_s0 = inlined_call_operand.vmem [shape: f32[8,128], index: 0, kind: input, shape index: {}]   ;;  %s570_s1 = inlined_call_operand.hbm [shape: bf16[128,128], index: 1, kind: input, shape index: {}]   ;;  %s571_s2 = inlined_call_operand.vmem [shape: f32[1,128], index: 2, kind: input, shape index: {}]   ;;  %s572_s3 = inlined_call_operand.hbm [shape: bf16[1,128,128], index: 3, kind: input, shape index: {}]   ;;  %s573_s4 = inlined_call_operand.vmem [shape: f32[1,1,128], index: 4, kind: input, shape index: {}]   ;;  %s574_s5 = inlined_call_operand.hbm [shape: f32[8,128], index: 5, kind: output, shape index: {}]  }
   0x1   :  { %11 = vsyncpa [#allocation6], 0 }
   0x2   :  { %12 = vsyncpa [#allocation4], 0  ;;  %s487_s18 = smov [#allocation2]   ;;  %s415_s22 = scalar_lea.hbm %s570_s1, 1024 }
   0x3   :  { %s20_s19 = sshll.u32 %s487_s18, 4  ;;  %p416_p0 = scmp.ne.s32.totalorder %s570_s1, %s415_s22  ;;  %s21_s19 = int_to_ptr.vmem [resolvable:$true] %s20_s19 }
   0x4   :  { %p419_p1 = scmp.lt.u32.totalorder %s415_s22, %s570_s1 }
   0x6   :  { %p421_p2 = pnand %p419_p1, %p416_p0 }
   0x8   :  { %424 = shalt.err (!%p421_p2)
}
   0x9   :  { %s425_s27 = scalar_lea.vmem %s21_s19, 1024  ;;  %p430_p4 = scmp.lt.s32.totalorder %s21_s19, %s21_s19 }
   0xa   :  { %p426_p3 = scmp.ne.s32.totalorder %s21_s19, %s425_s27  ;;  %p431_p5 = scmp.lt.s32.totalorder %s425_s27, %s425_s27 }
   0xc   :  { %p432_p6 = por %p431_p5, %p430_p4 }
   0xe   :  { %p433_p7 = pnand %p432_p6, %p426_p3 }
  0x10   :  { %436 = shalt.err (!%p433_p7)
}
  0x11   :  { %s488_s28 = smov 64   ;;  %s489_s29 = smov 4  }
  0x12   :  { %26 = dma.hbm_to_vmem [thread:$0]  %s570_s1, 1024, %s21_s19, [#allocation3], %s488_s28, %s488_s28, %s489_s29  }
  0x13   :  { %s490_s7 = smov [#allocation5]   ;;  %s437_s11 = scalar_lea.hbm %s572_s3, 1024 }
  0x14   :  { %s34_s8 = sshll.u32 %s490_s7, 4  ;;  %p438_p8 = scmp.ne.s32.totalorder %s572_s3, %s437_s11  ;;  %s35_s8 = int_to_ptr.vmem [resolvable:$true] %s34_s8 }
  0x15   :  { %p441_p9 = scmp.lt.u32.totalorder %s437_s11, %s572_s3 }
  0x17   :  { %p443_p10 = pnand %p441_p9, %p438_p8 }
  0x19   :  { %446 = shalt.err (!%p443_p10)
}
  0x1a   :  { %s447_s16 = scalar_lea.vmem %s35_s8, 1024  ;;  %p452_p12 = scmp.lt.s32.totalorder %s35_s8, %s35_s8 }
  0x1b   :  { %p448_p11 = scmp.ne.s32.totalorder %s35_s8, %s447_s16  ;;  %p453_p13 = scmp.lt.s32.totalorder %s447_s16, %s447_s16 }
  0x1d   :  { %p454_p0 = por %p453_p13, %p452_p12 }
  0x1f   :  { %p455_p1 = pnand %p454_p0, %p448_p11 }
  0x21   :  { %458 = shalt.err (!%p455_p1)
}
  0x22   :  { %40 = dma.hbm_to_vmem [thread:$0]  %s572_s3, 1024, %s35_s8, [#allocation6], %s488_s28, %s488_s28, %s489_s29  }
  0x23   :  { %481 = dma.done.wait [#allocation3], 1024  }
  0x24   :  { %482 = vsyncadd [#allocation3], 4294966272 }
  0x25   :  { %483 = dma.done.wait [#allocation6], 1024  }
  0x26   :  { %484 = vsyncadd [#allocation6], 4294966272  ;;  %v491_v0 = vmov 0.0   ;;  %vm492_vm0 = vmmov 0   ;;  %v391_v1 = vld [vmem:[#allocation2] sm:$0xff]   ;;  %v392_v2 = vld [vmem:[#allocation2 + $0x8] sm:$0xff]  }
  0x27   :  { %344 = vmatprep.subr.bf16.mxu0 %v491_v0  ;;  %360 = vmatprep.mubr.msk.bf16.mxu0 %vm492_vm0, %v491_v0  ;;  %v393_v3 = vld [vmem:[#allocation2 + $0x10] sm:$0xff]   ;;  %v394_v4 = vld [vmem:[#allocation2 + $0x18] sm:$0xff]   ;;  %v395_v5 = vld [vmem:[#allocation2 + $0x20] sm:$0xff]  }
  0x28   :  { %364 = vmatprep.subr.bf16.mxu1 %v491_v0  ;;  %380 = vmatprep.mubr.msk.bf16.mxu1 %vm492_vm0, %v491_v0  ;;  %v396_v6 = vld [vmem:[#allocation2 + $0x28] sm:$0xff]   ;;  %v397_v7 = vld [vmem:[#allocation2 + $0x30] sm:$0xff]   ;;  %v398_v8 = vld [vmem:[#allocation2 + $0x38] sm:$0xff]  }
  0x29   :  { %345 = vmatpush3.bf16.msra.mxu0 %v391_v1  ;;  %v50_v9 = vld [vmem:[%s569_s0] sm:$0xff]  ;;  %v400_v12 = vld [vmem:[#allocation5 + $0x8] sm:$0xff]   ;;  %v401_v13 = vld [vmem:[#allocation5 + $0x10] sm:$0xff]  }
  0x2a   :  { %346 = vmatprep.subr.bf16.mxu0 %v491_v0  ;;  %v68_v10 = vpack.c.bf16 %v50_v9, %v50_v9  ;;  %v399_v11 = vld [vmem:[#allocation5] sm:$0xff]   ;;  %v402_v14 = vld [vmem:[#allocation5 + $0x18] sm:$0xff]   ;;  %v404_v16 = vld [vmem:[#allocation5 + $0x28] sm:$0xff]  }
  0x2b   :  { %365 = vmatpush3.bf16.msra.mxu1 %v399_v11  ;;  %v403_v15 = vld [vmem:[#allocation5 + $0x20] sm:$0xff]   ;;  %v405_v17 = vld [vmem:[#allocation5 + $0x30] sm:$0xff]   ;;  %v406_v18 = vld [vmem:[#allocation5 + $0x38] sm:$0xff]  }
  0x2c   :  { %366 = vmatprep.subr.bf16.mxu1 %v491_v0  ;;  %v306_v19 = vld [vmem:[%s571_s2] ss:$0 sm:$0xff]  ;;  %s493_s2 = smov [#allocation7]  }
  0x2d   :  { %347 = vmatpush3.bf16.msra.mxu0 %v392_v2  ;;  %v316_v31 = vld [vmem:[%s573_s4] ss:$0 sm:$0xff]  ;;  %s296_s22 = sshll.u32 %s493_s2, 4  ;;  %s297_s22 = int_to_ptr.vmem [resolvable:$true] %s296_s22 }
  0x2e   :  { %348 = vmatprep.subr.bf16.mxu0 %v491_v0  ;;  %s459_s23 = scalar_lea.vmem %s297_s22, 128  ;;  %p464_p3 = scmp.lt.s32.totalorder %s297_s22, %s297_s22 }
  0x2f   :  { %367 = vmatpush3.bf16.msra.mxu1 %v400_v12  ;;  %p460_p2 = scmp.ne.s32.totalorder %s297_s22, %s459_s23  ;;  %p465_p4 = scmp.lt.s32.totalorder %s459_s23, %s459_s23 }
  0x30   :  { %368 = vmatprep.subr.bf16.mxu1 %v491_v0 }
  0x31   :  { %349 = vmatpush3.bf16.msra.mxu0 %v393_v3  ;;  %p466_p5 = por %p465_p4, %p464_p3 }
  0x32   :  { %350 = vmatprep.subr.bf16.mxu0 %v491_v0 }
  0x33   :  { %369 = vmatpush3.bf16.msra.mxu1 %v401_v13  ;;  %p467_p6 = pnand %p466_p5, %p460_p2 }
  0x34   :  { %370 = vmatprep.subr.bf16.mxu1 %v491_v0 }
  0x35   :  { %351 = vmatpush3.bf16.msra.mxu0 %v394_v4 }
  0x36   :  { %352 = vmatprep.subr.bf16.mxu0 %v491_v0 }
  0x37   :  { %371 = vmatpush3.bf16.msra.mxu1 %v402_v14 }
  0x38   :  { %372 = vmatprep.subr.bf16.mxu1 %v491_v0 }
  0x39   :  { %353 = vmatpush3.bf16.msra.mxu0 %v395_v5 }
  0x3a   :  { %354 = vmatprep.subr.bf16.mxu0 %v491_v0 }
  0x3b   :  { %373 = vmatpush3.bf16.msra.mxu1 %v403_v15 }
  0x3c   :  { %374 = vmatprep.subr.bf16.mxu1 %v491_v0 }
  0x3d   :  { %355 = vmatpush3.bf16.msra.mxu0 %v396_v6 }
  0x3e   :  { %356 = vmatprep.subr.bf16.mxu0 %v491_v0 }
  0x3f   :  { %375 = vmatpush3.bf16.msra.mxu1 %v404_v16 }
  0x40   :  { %376 = vmatprep.subr.bf16.mxu1 %v491_v0 }
  0x41   :  { %357 = vmatpush3.bf16.msra.mxu0 %v397_v7 }
  0x42   :  { %358 = vmatprep.subr.bf16.mxu0 %v491_v0 }
  0x43   :  { %377 = vmatpush3.bf16.msra.mxu1 %v405_v17 }
  0x44   :  { %378 = vmatprep.subr.bf16.mxu1 %v491_v0 }
  0x45   :  { %359 = vmatpush3.bf16.msra.mxu0 %v398_v8 }
  0x47   :  { %379 = vmatpush3.bf16.msra.mxu1 %v406_v18 }
  0x48   :  { %361 = vmatmul.mubr.bf16.vlgmr.msra.gmra.mrb[0].mxu0 %v68_v10 }
 0x11b   :  { %v157_v20 = vpop.f32.mrb[0].mxu0 }
 0x11c   :  { %v158_v21 = vadd.f32 %v306_v19, %v157_v20  ;;  %v362_v22 = vpop.f32.mrb[1].mxu0 }
 0x11d   :  { %v160_v23 = vpop.f32.mrb[2].mxu0 }
 0x11e   :  { %v315_v24 = vmul.f32 -1.442695, %v158_v21  ;;  %v363_v25 = vpop.f32.mrb[3].mxu0 }
 0x120   :  { %407 = vpow2.f32 %v315_v24 }
 0x12a   :  { %v408_v26 = vpop.eup %407 }
 0x12b   :  { %v166_v27 = vadd.f32 1.0, %v408_v26 }
 0x12d   :  { %409 = vrcp.f32 %v166_v27 }
 0x137   :  { %v410_v28 = vpop.eup %409 }
 0x138   :  { %v169_v29 = vmul.f32 %v410_v28, %v158_v21 }
 0x13a   :  { %v187_v30 = vpack.c.bf16 %v169_v29, %v169_v29 }
 0x13c   :  { %381 = vmatmul.mubr.bf16.vlgmr.msra.gmra.mrb[0].mxu1 %v187_v30 }
 0x20f   :  { %v276_v32 = vpop.f32.mrb[0].mxu1 }
 0x210   :  { %v277_v33 = vadd.f32 %v316_v31, %v276_v32  ;;  %v382_v34 = vpop.f32.mrb[1].mxu1 }
 0x211   :  { %v279_v35 = vpop.f32.mrb[2].mxu1 }
 0x212   :  { %v325_v36 = vmul.f32 -1.442695, %v277_v33  ;;  %v383_v37 = vpop.f32.mrb[3].mxu1 }
 0x214   :  { %411 = vpow2.f32 %v325_v36 }
 0x21e   :  { %v412_v38 = vpop.eup %411 }
 0x21f   :  { %v285_v39 = vadd.f32 1.0, %v412_v38 }
 0x221   :  { %413 = vrcp.f32 %v285_v39 }
 0x22b   :  { %v414_v40 = vpop.eup %413 }
 0x22c   :  { %v288_v41 = vmul.f32 %v414_v40, %v277_v33 }
 0x22e   :  { %289 = vst [vmem:[#allocation7] sm:$0xff] %v288_v41 }
 0x22f   :  { %470 = shalt.err (!%p467_p6)
}
 0x230   :  { %s471_s25 = scalar_lea.hbm %s574_s5, 128 }
 0x231   :  { %p472_p7 = scmp.ne.s32.totalorder %s574_s5, %s471_s25  ;;  %p475_p8 = scmp.lt.u32.totalorder %s471_s25, %s574_s5 }
 0x233   :  { %p477_p9 = pnand %p475_p8, %p472_p7 }
 0x235   :  { %480 = shalt.err (!%p477_p9)
}
 0x236   :  { %299 = dma.vmem_to_hbm [thread:$0]  %s297_s22, 128, %s574_s5, [#allocation4]  }
 0x237   :  { %485 = dma.done.wait [#allocation4], 128  }
 0x238   :  { %486 = vsyncadd [#allocation4], 4294967168 }
 0x239   :  { %303 = vsyncpa [#allocation3], 1 }
 0x23a   :  { %304 = vsyncpa [#allocation6], 1 }
 0x23b   :  { %305 = vsyncpa [#allocation4], 1 }

</bundles_post_ra>
